<compile_context>
chip_gen: v6e
topology: v6e:2x2x1
jax: 0.10.0
libtpu: 0.0.40
codegen_flags: <defaults>
</compile_context>

<pallas_src>
import jax
import jax.numpy as jnp
from jax import lax
from jax.experimental import pallas as pl
from jax.experimental.pallas import tpu as pltpu


def _round_up(x: int, m: int) -> int:
    return ((x + m - 1) // m) * m


def _detect_tensorcores() -> int:
    """Conservative: returns >1 only if the hardware query exposes a core count."""
    try:
        info = pltpu.get_tpu_info()
    except Exception:
        return 1
    for name in ("num_cores", "core_count", "num_tensorcores",
                 "tensorcore_count", "cores_per_chip"):
        v = getattr(info, name, None)
        if isinstance(v, int) and v >= 1:
            return min(int(v), 2)
    return 1


def hamming_loss(pred_perm: jax.Array, gt_perm: jax.Array, *,
                 lane_candidates=(512, 256, 128),
                 target_block_bytes: int = 4 << 20,
                 num_slices=None) -> jax.Array:
    """pred_perm, gt_perm: (b, n1, n2).  Returns float32 scalar
    == (pred*(1-gt) + (1-pred)*gt).mean(axis=0).sum()."""
    b, n1, n2 = pred_perm.shape
    assert gt_perm.shape == pred_perm.shape
    total = b * n1 * n2
    itemsize = jnp.dtype(pred_perm.dtype).itemsize

    # ---- zero-copy 2-D view (reshape of a contiguous array is a bitcast) ----
    cols = next((L for L in lane_candidates if total % L == 0), None)
    if cols is None:
        # No multiple-of-128 divisor: collapse leading dims.  Lane-sparse but
        # zero extra HBM traffic (no pad / prefix-slice copy anywhere).
        cols = n2
    rows = total // cols
    p2 = pred_perm.reshape(rows, cols)
    g2 = gt_perm.reshape(rows, cols)

    # ---- tile geometry from a byte budget ----
    lane_pad = _round_up(cols, 128)
    max_rows = max(8, (target_block_bytes // (lane_pad * itemsize)) // 8 * 8)
    tile_rows = rows if rows <= max_rows else max_rows   # full dim or multiple of 8

    nblocks = pl.cdiv(rows, tile_rows)
    cores = _detect_tensorcores() if num_slices is None else int(num_slices)
    nslices = max(1, min(cores, nblocks))
    steps = pl.cdiv(nblocks, nslices)
    need_mask = (tile_rows * nblocks != rows) or (steps * nslices != nblocks)

    def kernel(p_ref, g_ref, o_ref, acc_ref):
        j = pl.program_id(1)

        @pl.when(j == 0)
        def _():
            acc_ref[...] = jnp.zeros_like(acc_ref)

        p = p_ref[...].astype(jnp.float32)
        g = g_ref[...].astype(jnp.float32)
        # Algebraically identical to p*(1-g) + (1-p)*g, 3 VPU ops instead of 5.
        err = p + g - 2.0 * p * g

        if need_mask:
            # Ragged last block (and any replicated overflow block): zero the
            # rows that fall outside the logical [0, rows) range.
            blk = pl.program_id(0) * steps + j
            valid = rows - blk * tile_rows
            row_id = lax.broadcasted_iota(jnp.int32, (tile_rows, cols), 0)
            err = jnp.where(row_id < valid, err, 0.0)

        if tile_rows % 8 == 0:
            # vreg-scale accumulator: pure VALU adds, no big acc RMW per step.
            acc_ref[...] += err.reshape(tile_rows // 8, 8, cols).sum(axis=0)
        else:
            # Only reachable when the whole array is a single (rows, cols) block.
            psum = jnp.sum(err, axis=0, keepdims=True)          # (1, cols)
            acc_ref[0:1, :] = acc_ref[0:1, :] + psum

        @pl.when(j == pl.num_programs(1) - 1)
        def _():
            col = jnp.sum(acc_ref[...], axis=1, keepdims=True)  # (8, 1)
            tot = jnp.sum(col, axis=0, keepdims=True)           # (1, 1)
            o_ref[...] = tot.reshape(o_ref.shape)

    if steps * nslices == nblocks:
        def in_idx(i, j):
            return (i * steps + j, 0)
    else:
        # Clamp so no block index is fully out of range; the row mask zeroes
        # the (re-read) data of overflow blocks, keeping the sum exact.
        def in_idx(i, j):
            return (jnp.minimum(i * steps + j, nblocks - 1), 0)

    in_spec = pl.BlockSpec((tile_rows, cols), in_idx)
    grid_spec = pltpu.PrefetchScalarGridSpec(
        num_scalar_prefetch=0,
        grid=(nslices, steps),
        in_specs=[in_spec, in_spec],
        # One resident (1,1,1) output block per slice; written on the last step.
        out_specs=pl.BlockSpec((1, 1, 1), lambda i, j: (i, 0, 0)),
        scratch_shapes=[pltpu.VMEM((8, cols), jnp.float32)],
    )

    # VMEM limit from the actual working set (2 inputs x 2 pipeline buffers)
    # plus headroom for Mosaic internal scratch.
    block_bytes = _round_up(tile_rows, 8) * lane_pad * itemsize
    vmem_limit = int(min(max(4 * block_bytes + 8 * lane_pad * 4 + (6 << 20),
                             16 << 20), 100 << 20))

    def _call(sems):
        return pl.pallas_call(
            kernel,
            out_shape=jax.ShapeDtypeStruct((nslices, 1, 1), jnp.float32),
            grid_spec=grid_spec,
            compiler_params=pltpu.CompilerParams(
                dimension_semantics=sems, vmem_limit_bytes=vmem_limit),
        )(p2, g2)

    if nslices > 1:
        try:
            # Explicit core-level sharding so both v7x TensorCores stream rows.
            out = _call((pltpu.CORE_PARALLEL, pltpu.ARBITRARY))
        except Exception:
            out = _call(("parallel", "arbitrary"))
    else:
        out = _call(("arbitrary", "arbitrary"))

    # mean over batch then sum over (n1, n2)  ==  total error sum / b
    return jnp.sum(out) / jnp.float32(b)


def _reference(pred_perm, gt_perm):
    errors = pred_perm * (1.0 - gt_perm) + (1.0 - pred_perm) * gt_perm
    return errors.mean(axis=0).sum()


if __name__ == "__main__":
    key = jax.random.PRNGKey(0)

    # Case 1: permutation-like inputs, b=2, n1=n2=16 (lane-dense path, single block).
    b, n1, n2 = 2, 16, 16
    k1, k2 = jax.random.split(key)
    pred = jax.nn.softmax(jax.random.normal(k1, (b, n1, n2), jnp.float32), axis=-1)
    perm_idx = jax.random.permutation(k2, n2)
    gt = jnp.broadcast_to(jnp.eye(n1, n2, dtype=jnp.float32)[perm_idx], (b, n1, n2))
    loss = hamming_loss(pred, gt)
    jax.block_until_ready(loss)
    ref = _reference(pred, gt)
    assert jnp.allclose(loss, ref, rtol=1e-5, atol=1e-5), (loss, ref)

    # Case 2: flattened size with no multiple-of-128 divisor -> zero-copy
    # (b*n1, n2) fallback layout (no padding anywhere).
    b2, m1, m2 = 3, 20, 20
    k3, k4 = jax.random.split(k2)
    pred2 = jax.nn.sigmoid(jax.random.normal(k3, (b2, m1, m2), jnp.float32))
    gt2 = (jax.random.uniform(k4, (b2, m1, m2)) > 0.9).astype(jnp.float32)
    loss2 = hamming_loss(pred2, gt2)
    jax.block_until_ready(loss2)
    ref2 = _reference(pred2, gt2)
    assert jnp.allclose(loss2, ref2, rtol=1e-5, atol=1e-5), (loss2, ref2)

    # Case 3: multi-step grid with a ragged (masked) last row block; a small
    # byte budget forces tiling so the accumulate/mask paths are exercised.
    b3, m3, m4 = 2, 48, 64
    k5, k6 = jax.random.split(k4)
    pred3 = jax.nn.sigmoid(jax.random.normal(k5, (b3, m3, m4), jnp.float32))
    gt3 = (jax.random.uniform(k6, (b3, m3, m4)) > 0.8).astype(jnp.float32)
    loss3 = hamming_loss(pred3, gt3, target_block_bytes=16 * 1024)
    jax.block_until_ready(loss3)
    ref3 = _reference(pred3, gt3)
    assert jnp.allclose(loss3, ref3, rtol=1e-5, atol=1e-4), (loss3, ref3)

    # Case 4: native bf16 inputs stream at half the HBM bytes (kernel upcasts).
    pred4 = pred.astype(jnp.bfloat16)
    gt4 = gt.astype(jnp.bfloat16)
    loss4 = hamming_loss(pred4, gt4)
    jax.block_until_ready(loss4)
    ref4 = _reference(pred4.astype(jnp.float32), gt4.astype(jnp.float32))
    assert jnp.allclose(loss4, ref4, rtol=1e-4, atol=1e-4), (loss4, ref4)

    print("KERNEL_OK")
</pallas_src>

<mosaic_0001>
module attributes {stable_mosaic.version = 11 : i64} {
  func.func @kernel(%arg0: i32, %arg1: i32, %arg2: memref<1x512xf32, #tpu.memory_space<vmem>>, %arg3: memref<1x512xf32, #tpu.memory_space<vmem>>, %arg4: memref<1x1x1xf32, #tpu.memory_space<vmem>>, %arg5: memref<8x512xf32, #tpu.memory_space<vmem>>) attributes {dimension_semantics = [#tpu.dimension_semantics<arbitrary>, #tpu.dimension_semantics<arbitrary>], iteration_bounds = array<i64: 1, 1>, scalar_prefetch = 0 : i64, scratch_operands = 1 : i64, tpu.core_type = #tpu.core_type<tc>, window_params = [{transform_indices = @transform_0, window_bounds = array<i64: 1, 512>}, {transform_indices = @transform_1, window_bounds = array<i64: 1, 512>}, {transform_indices = @transform_2, window_bounds = array<i64: 1, 1, 1>}]} {
    %c0_i32 = arith.constant 0 : i32
    %0 = arith.cmpi eq, %arg1, %c0_i32 : i32
    %1 = arith.extui %0 : i1 to i32
    %c0_i32_0 = arith.constant 0 : i32
    %2 = arith.cmpi ne, %1, %c0_i32_0 : i32
    scf.if %2 {
      %cst_11 = arith.constant 0.000000e+00 : f32
      %18 = vector.broadcast %cst_11 : f32 to vector<8x512xf32>
      %c0_12 = arith.constant 0 : index
      %c0_13 = arith.constant 0 : index
      %19 = vector.load %arg5[%c0_12, %c0_13] : memref<8x512xf32, #tpu.memory_space<vmem>>, vector<8x512xf32>
      tpu.vector_store %arg5[%c0_12, %c0_13], %18 {strides = array<i32>} : memref<8x512xf32, #tpu.memory_space<vmem>>, vector<8x512xf32>,
    } else {
    }
    %c0 = arith.constant 0 : index
    %c0_1 = arith.constant 0 : index
    %3 = vector.load %arg2[%c0, %c0_1] : memref<1x512xf32, #tpu.memory_space<vmem>>, vector<1x512xf32>
    %c0_2 = arith.constant 0 : index
    %c0_3 = arith.constant 0 : index
    %4 = vector.load %arg3[%c0_2, %c0_3] : memref<1x512xf32, #tpu.memory_space<vmem>>, vector<1x512xf32>
    %5 = arith.addf %3, %4 : vector<1x512xf32>
    %cst = arith.constant 2.000000e+00 : f32
    %6 = vector.broadcast %cst : f32 to vector<1x512xf32>
    %7 = arith.mulf %6, %3 : vector<1x512xf32>
    %8 = arith.mulf %7, %4 : vector<1x512xf32>
    %9 = arith.subf %5, %8 : vector<1x512xf32>
    %cst_4 = arith.constant dense<0.000000e+00> : vector<512xf32>
    %10 = vector.multi_reduction <add>, %9, %cst_4 [0] : vector<1x512xf32> to vector<512xf32>
    %11 = vector.shape_cast %10 : vector<512xf32> to vector<1x512xf32>
    %c0_5 = arith.constant 0 : index
    %c0_6 = arith.constant 0 : index
    %12 = vector.load %arg5[%c0_5, %c0_6] : memref<8x512xf32, #tpu.memory_space<vmem>>, vector<1x512xf32>
    %13 = arith.addf %12, %11 : vector<1x512xf32>
    %c0_7 = arith.constant 0 : index
    %c0_8 = arith.constant 0 : index
    %14 = vector.load %arg5[%c0_7, %c0_8] : memref<8x512xf32, #tpu.memory_space<vmem>>, vector<1x512xf32>
    tpu.vector_store %arg5[%c0_7, %c0_8], %13 {strides = array<i32>} : memref<8x512xf32, #tpu.memory_space<vmem>>, vector<1x512xf32>,
    %c0_i32_9 = arith.constant 0 : i32
    %15 = arith.cmpi eq, %arg1, %c0_i32_9 : i32
    %16 = arith.extui %15 : i1 to i32
    %c0_i32_10 = arith.constant 0 : i32
    %17 = arith.cmpi ne, %16, %c0_i32_10 : i32
    scf.if %17 {
      %c0_11 = arith.constant 0 : index
      %c0_12 = arith.constant 0 : index
      %18 = vector.load %arg5[%c0_11, %c0_12] : memref<8x512xf32, #tpu.memory_space<vmem>>, vector<8x512xf32>
      %cst_13 = arith.constant dense<0.000000e+00> : vector<8xf32>
      %19 = vector.multi_reduction <add>, %18, %cst_13 [1] : vector<8x512xf32> to vector<8xf32>
      %20 = vector.shape_cast %19 : vector<8xf32> to vector<8x1xf32>
      %cst_14 = arith.constant dense<0.000000e+00> : vector<1xf32>
      %21 = vector.multi_reduction <add>, %20, %cst_14 [0] : vector<8x1xf32> to vector<1xf32>
      %22 = vector.shape_cast %21 : vector<1xf32> to vector<1x1xf32>
      %23 = vector.shape_cast %22 : vector<1x1xf32> to vector<1x1x1xf32>
      %c0_15 = arith.constant 0 : index
      %c0_16 = arith.constant 0 : index
      %c0_17 = arith.constant 0 : index
      %24 = vector.load %arg4[%c0_15, %c0_16, %c0_17] : memref<1x1x1xf32, #tpu.memory_space<vmem>>, vector<1x1x1xf32>
      tpu.vector_store %arg4[%c0_15, %c0_16, %c0_17], %23 {strides = array<i32>} : memref<1x1x1xf32, #tpu.memory_space<vmem>>, vector<1x1x1xf32>,
    } else {
    }
    return
  }
  func.func @transform_0(%arg0: i32, %arg1: i32) -> (i32, i32) {
    %c1_i32 = arith.constant 1 : i32
    %0 = arith.muli %arg0, %c1_i32 : i32
    %1 = arith.addi %0, %arg1 : i32
    %c0_i32 = arith.constant 0 : i32
    %c0_i32_0 = arith.constant 0 : i32
    return %1, %c0_i32 : i32, i32
  }
  func.func @transform_1(%arg0: i32, %arg1: i32) -> (i32, i32) {
    %c1_i32 = arith.constant 1 : i32
    %0 = arith.muli %arg0, %c1_i32 : i32
    %1 = arith.addi %0, %arg1 : i32
    %c0_i32 = arith.constant 0 : i32
    %c0_i32_0 = arith.constant 0 : i32
    return %1, %c0_i32 : i32, i32
  }
  func.func @transform_2(%arg0: i32, %arg1: i32) -> (i32, i32, i32) {
    %c0_i32 = arith.constant 0 : i32
    %c0_i32_0 = arith.constant 0 : i32
    %c0_i32_1 = arith.constant 0 : i32
    return %arg0, %c0_i32, %c0_i32_0 : i32, i32, i32
  }
}

</mosaic_0001>

<bundles_post_ra>
// kernel: tpu_custom_call.1
= control target key start
LH: loop header
LB: loop body
LE: loop exit
PB: predicated region body
PF: predicated region fallthrough
CT: control target
= control target key end

     0   :  { %7 = vsyncpa [#allocation4], 0  ;;  %s203_s0 = inlined_call_operand.hbm [shape: f32[1,512], index: 0, kind: input, shape index: {}]   ;;  %s204_s1 = inlined_call_operand.hbm [shape: f32[1,512], index: 1, kind: input, shape index: {}]   ;;  %s205_s2 = inlined_call_operand.hbm [shape: f32[1,1,1], index: 2, kind: output, shape index: {}]  }
   0x1   :  { %8 = vsyncpa [#allocation7], 0 }
   0x2   :  { %9 = vsyncpa [#allocation5], 0  ;;  %s175_s9 = smov [#allocation3]   ;;  %s176_s11 = smov [#allocation6]  }
   0x3   :  { %s20_s10 = sshll.u32 %s175_s9, 4  ;;  %s34_s12 = sshll.u32 %s176_s11, 4  ;;  %s21_s10 = int_to_ptr.vmem [resolvable:$true] %s20_s10  ;;  %s35_s12 = int_to_ptr.vmem [resolvable:$true] %s34_s12 }
   0x4   :  { %s117_s13 = scalar_lea.vmem %s21_s10, 64  ;;  %p122_p1 = scmp.lt.s32.totalorder %s21_s10, %s21_s10 }
   0x5   :  { %p118_p0 = scmp.ne.s32.totalorder %s21_s10, %s117_s13  ;;  %p123_p2 = scmp.lt.s32.totalorder %s117_s13, %s117_s13 }
   0x7   :  { %p124_p3 = por %p123_p2, %p122_p1 }
   0x9   :  { %p125_p4 = pnand %p124_p3, %p118_p0 }
   0xb   :  { %128 = shalt.err (!%p125_p4)
}
   0xc   :  { %23 = dma.hbm_to_vmem [thread:$0]  %s203_s0, 64, %s21_s10, [#allocation4]  }
   0xd   :  { %s137_s16 = scalar_lea.vmem %s35_s12, 64  ;;  %p142_p6 = scmp.lt.s32.totalorder %s35_s12, %s35_s12 }
   0xe   :  { %p138_p5 = scmp.ne.s32.totalorder %s35_s12, %s137_s16  ;;  %p143_p7 = scmp.lt.s32.totalorder %s137_s16, %s137_s16 }
  0x10   :  { %p144_p8 = por %p143_p7, %p142_p6 }
  0x12   :  { %p145_p9 = pnand %p144_p8, %p138_p5 }
  0x14   :  { %148 = shalt.err (!%p145_p9)
}
  0x15   :  { %37 = dma.hbm_to_vmem [thread:$0]  %s204_s1, 64, %s35_s12, [#allocation7]  }
  0x16   :  { %169 = dma.done.wait [#allocation4], 64  }
  0x17   :  { %170 = vsyncadd [#allocation4], 4294967232 }
  0x18   :  { %171 = dma.done.wait [#allocation7], 64  }
  0x19   :  { %172 = vsyncadd [#allocation7], 4294967232  ;;  %v177_v0 = vmov 0.0   ;;  %v54_v1 = vld [vmem:[#allocation3] sm:$0xf]  ;;  %v63_v5 = vlaneseq  ;;  %s178_s0 = smov [#allocation8]  }
  0x1a   :  { %50 = vst [vmem:[#allocation2] sm:$0xff] %v177_v0  ;;  %51 = vst [vmem:[#allocation2 + $0x8] sm:$0xff] %v177_v0  ;;  %v55_v2 = vld [vmem:[#allocation6] sm:$0xf]  ;;  %v57_v4 = vmul.f32 2.0, %v54_v1  ;;  %s95_s1 = sshll.u32 %s178_s0, 4  ;;  %s96_s1 = int_to_ptr.vmem [resolvable:$true] %s95_s1 }
  0x1b   :  { %52 = vst [vmem:[#allocation2 + $0x10] sm:$0xff] %v177_v0  ;;  %53 = vst [vmem:[#allocation2 + $0x18] sm:$0xff] %v177_v0  ;;  %v56_v3 = vadd.f32 %v55_v2, %v54_v1  ;;  %vm65_vm0 = vcmp.lt.s32.totalorder %v63_v5, 512  ;;  %vm87_vm1 = vcmask 0   ;;  %s149_s19 = scalar_lea.vmem %s96_s1, 16  ;;  %s153_s20 = scalar_lea.vmem %s96_s1, 32 }
  0x1c   :  { %v58_v6 = vmul.f32 %v57_v4, %v55_v2  ;;  %p150_p10 = scmp.ne.s32.totalorder %s96_s1, %s149_s19  ;;  %p154_p11 = scmp.lt.s32.totalorder %s96_s1, %s96_s1 }
  0x1d   :  { %p155_p12 = scmp.lt.s32.totalorder %s153_s20, %s149_s19 }
  0x1e   :  { %v59_v8 = vsub.f32 %v56_v3, %v58_v6 }
  0x1f   :  { %p156_p13 = por %p155_p12, %p154_p11 }
  0x21   :  { %p157_p0 = pnand %p156_p13, %p150_p10 }
  0x22   :  { %v61_v7 = vld [vmem:[#allocation2] ss:$8 sm:$0xf] }
  0x23   :  { %v62_v9 = vadd.f32 %v61_v7, %v59_v8 }
  0x25   :  { %67 = vst.msk [vmem:[#allocation2] ss:$8 sm:$0xf] %vm65_vm0, %v62_v9 }
  0x2c   :  { %v72_v10 = vld [vmem:[#allocation2] sm:$0xff]  ;;  %v73_v11 = vld [vmem:[#allocation2 + $0x8] sm:$0xff]  ;;  %v74_v12 = vld [vmem:[#allocation2 + $0x10] sm:$0xff] }
  0x2d   :  { %v76_v13 = vadd.f32 %v73_v11, %v72_v10  ;;  %v75_v14 = vld [vmem:[#allocation2 + $0x18] sm:$0xff] }
  0x2f   :  { %v77_v15 = vadd.f32 %v76_v13, %v74_v12 }
  0x31   :  { %v78_v16 = vadd.f32 %v77_v15, %v75_v14 }
  0x33   :  { %79 = vadd.xlane.f32.xlu0 %v78_v16 }
  0xbc   :  { %v80_v17 = vpop.xlane.xlu0 %79 }
  0xbd   :  { %v81_v18 = vrot.slane %v80_v17, 4 }
  0xbf   :  { %v82_v19 = vadd.f32 %v81_v18, %v80_v17 }
  0xc1   :  { %v83_v20 = vrot.slane %v82_v19, 2 }
  0xc3   :  { %v84_v21 = vadd.f32 %v83_v20, %v82_v19 }
  0xc5   :  { %v85_v22 = vrot.slane %v84_v21, 1 }
  0xc7   :  { %v86_v23 = vadd.f32 %v85_v22, %v84_v21 }
  0xc9   :  { %88 = vst.msk [vmem:[#allocation8] sm:$0x1] %vm87_vm1, %v86_v23 }
  0xca   :  { %160 = shalt.err (!%p157_p0)
}
  0xcb   :  { %98 = dma.vmem_to_hbm [thread:$0]  %s96_s1, 16, %s205_s2, [#allocation5]  }
  0xcc   :  { %173 = dma.done.wait [#allocation5], 16  }
  0xcd   :  { %174 = vsyncadd [#allocation5], 4294967280 }
  0xce   :  { %102 = vsyncpa [#allocation4], 1 }
  0xcf   :  { %103 = vsyncpa [#allocation7], 1 }
  0xd0   :  { %104 = vsyncpa [#allocation5], 1 }

</bundles_post_ra>
